<compile_context>
chip_gen: v7x
topology: tpu7x:2x2x1
jax: 0.10.0
libtpu: 0.0.40
codegen_flags: <defaults>
</compile_context>

<pallas_src>
import functools
import math

import jax
import jax.numpy as jnp
from jax import lax
from jax.experimental import pallas as pl
from jax.experimental.pallas import tpu as pltpu


_FUSED_SLAB_BYTES = 3 << 20     # (chunks*M*itemsize): 2*(in+out) dbl-buffered <= 12 MiB
_STATS_TILE_BYTES = 2 << 20     # pass-1 input block
_APPLY_TILE_BYTES = 2 << 20     # pass-2 input block (output block same size)
_VALUE_TILE_ELEMS = 16384       # ~64 KiB f32 live value per streamed slice
_WHOLE_SLAB_ELEMS = 16384       # slab processable without in-kernel streaming
_UNROLL_COLS = 32               # static (unrolled) column loop up to this count


def _scale_fix(M):
    return (0.5 * 0.35 * (1.0 + (math.pi * math.log(4.0)) ** 0.5)
            / (2.0 * math.log(M)) ** 0.5)


def _largest_aligned_divisor(n, cap, step=128):
    """Largest multiple of `step` that divides n and is <= max(cap, step).

    Caller guarantees n % step == 0 and n >= step.
    """
    k = max(step, (min(n, cap) // step) * step)
    while k > step:
        if n % k == 0:
            return k
        k -= step
    return step


def _fold_minmax(load, n_col, col_w):
    """Running element-wise (VPU) max/min over `n_col` column slices."""
    mx = load(0)
    mn = mx
    if n_col > 1:
        if n_col <= _UNROLL_COLS:
            for k in range(1, n_col):
                xs = load(k * col_w)
                mx = jnp.maximum(mx, xs)
                mn = jnp.minimum(mn, xs)
        else:
            def body(k, carry):
                cmx, cmn = carry
                xs = load(pl.multiple_of(k * col_w, col_w))
                return jnp.maximum(cmx, xs), jnp.minimum(cmn, xs)
            mx, mn = lax.fori_loop(1, n_col, body, (mx, mn))
    return mx, mn


# ----------------------------------------------------------------------------
# Fused single-pass kernel: stats + apply on a VMEM-resident (b, g) slab
# ----------------------------------------------------------------------------
def _fused_kernel(x_ref, p_ref, o_ref, *, scale_fix, eps, col_w, n_col):
    # x_ref/o_ref: (1, chunks, M)   one (batch, group) slab
    # p_ref:       (1, 3, chunks, 1) per-chunk-row [v, w, b] (f32)
    v_col = p_ref[0, 0]                                       # (chunks, 1)
    w_col = p_ref[0, 1]
    b_col = p_ref[0, 2]

    # ---- range statistics (streamed from the resident slab) ---------------
    def load(off):
        return x_ref[0, :, pl.ds(off, col_w)]
    mx, mn = _fold_minmax(load, n_col, col_w)                 # (chunks, col_w)
    row_max = jnp.max(mx, axis=-1, keepdims=True).astype(jnp.float32)
    row_min = jnp.min(mn, axis=-1, keepdims=True).astype(jnp.float32)
    mean_max = jnp.mean(row_max, axis=0, keepdims=True)       # (1, 1)
    mean_min = jnp.mean(row_min, axis=0, keepdims=True)
    denom = (mean_max - mean_min) * scale_fix + eps           # == 1 / scale
    w_eff = w_col * denom                                     # (chunks, 1)

    # ---- apply: out = x*sigmoid(x*v) * (w/scale) + b -----------------------
    def apply_at(off):
        xs = x_ref[0, :, pl.ds(off, col_w)].astype(jnp.float32)
        sig = 0.5 * jnp.tanh(0.5 * (xs * v_col)) + 0.5        # sigmoid via EUP
        o_ref[0, :, pl.ds(off, col_w)] = (xs * sig * w_eff
                                          + b_col).astype(o_ref.dtype)

    if n_col <= _UNROLL_COLS:
        for k in range(n_col):
            apply_at(k * col_w)
    else:
        def body(k, carry):
            apply_at(pl.multiple_of(k * col_w, col_w))
            return carry
        lax.fori_loop(0, n_col, body, 0)


# ----------------------------------------------------------------------------
# Two-pass fallback, pass 1: per-(batch, group) range statistics -> denom
# ----------------------------------------------------------------------------
def _stats_kernel(x_ref, den_ref, mx_ref, mn_ref, *, scale_fix, eps,
                  col_w, n_col):
    # x_ref: (1, chunks, tm); den_ref: (1, 1); mx/mn scratch: (chunks, 1) f32
    j = pl.program_id(1)

    @pl.when(j == 0)
    def _():
        mx_ref[...] = jnp.full(mx_ref.shape, -jnp.inf, jnp.float32)
        mn_ref[...] = jnp.full(mn_ref.shape, jnp.inf, jnp.float32)

    def load(off):
        return x_ref[0, :, pl.ds(off, col_w)]
    mx, mn = _fold_minmax(load, n_col, col_w)
    mx_ref[...] = jnp.maximum(
        mx_ref[...], jnp.max(mx, axis=-1, keepdims=True).astype(jnp.float32))
    mn_ref[...] = jnp.minimum(
        mn_ref[...], jnp.min(mn, axis=-1, keepdims=True).astype(jnp.float32))

    @pl.when(j == pl.num_programs(1) - 1)
    def _():
        mean_max = jnp.mean(mx_ref[...], axis=0, keepdims=True)   # (1, 1)
        mean_min = jnp.mean(mn_ref[...], axis=0, keepdims=True)
        den_ref[...] = ((mean_max - mean_min) * scale_fix
                        + eps).astype(den_ref.dtype)


# ----------------------------------------------------------------------------
# Two-pass fallback, pass 2: elementwise apply with packed per-row params
# ----------------------------------------------------------------------------
def _apply_kernel(x_ref, p_ref, o_ref, *, rs, cw, apply_act):
    # x_ref/o_ref: (tr, HW);  p_ref: (tr, 4) packed [v, w_eff, b, 0] (f32)
    tr, hw = x_ref.shape
    for r0 in range(0, tr, rs):
        rl = min(rs, tr - r0)
        w_eff = p_ref[r0:r0 + rl, 1:2]                       # (rl, 1)
        b_col = p_ref[r0:r0 + rl, 2:3]
        if apply_act:
            v_col = p_ref[r0:r0 + rl, 0:1]
        for c0 in range(0, hw, cw):
            cl = min(cw, hw - c0)
            xs = x_ref[r0:r0 + rl, c0:c0 + cl].astype(jnp.float32)
            if apply_act:
                sig = 0.5 * jnp.tanh(0.5 * (xs * v_col)) + 0.5
                y = xs * sig
            else:
                y = xs
            o_ref[r0:r0 + rl, c0:c0 + cl] = (y * w_eff
                                             + b_col).astype(o_ref.dtype)


# ----------------------------------------------------------------------------
# Wrapper: RangeEN_full.forward
# ----------------------------------------------------------------------------
def range_en_full(x, weight, bias, v, *, chunks=16, groups=8, eps=1e-5,
                  apply_act=True):
    """Forward of RangeEN_full.  x: (B, C, H, W); weight/bias/v: (1, C, 1, 1)."""
    assert x.ndim == 4, "expected 4D input"
    B, C, H, W = x.shape
    assert C % groups == 0
    Cg = C // groups
    HW = H * W
    per_group = Cg * HW
    assert per_group % chunks == 0
    M = per_group // chunks
    BG = B * groups
    R = B * C
    itemsize = x.dtype.itemsize
    dtype = x.dtype

    if apply_act:
        assert M > 1, "chunk size must be > 1 (log(M) in scale_fix)"
        sfix = _scale_fix(M)

        # ---------------- fused single-pass path ----------------------------
        slab_bytes = chunks * M * itemsize
        fused_ok = (chunks % Cg == 0
                    and slab_bytes <= _FUSED_SLAB_BYTES
                    and (M % 128 == 0 or chunks * M <= _WHOLE_SLAB_ELEMS))
        if fused_ok:
            if M % 128 == 0:
                col_w = _largest_aligned_divisor(
                    M, max(128, (_VALUE_TILE_ELEMS // chunks) // 128 * 128))
            else:
                col_w = M
            n_col = M // col_w

            s = chunks // Cg                       # chunk rows per channel

            def _chunk_params(p):                  # (1,C,1,1) -> (BG, chunks)
                p = p.reshape(C).astype(jnp.float32)
                p = jnp.broadcast_to(p[None, :], (B, C)).reshape(BG, Cg)
                return jnp.repeat(p, s, axis=1)

            params = jnp.stack([_chunk_params(v), _chunk_params(weight),
                                _chunk_params(bias)], axis=1)[..., None]
            # params: (BG, 3, chunks, 1)

            xg = x.reshape(BG, chunks, M)
            out = pl.pallas_call(
                functools.partial(_fused_kernel, scale_fix=sfix, eps=eps,
                                  col_w=col_w, n_col=n_col),
                out_shape=jax.ShapeDtypeStruct((BG, chunks, M), dtype),
                grid_spec=pltpu.PrefetchScalarGridSpec(
                    num_scalar_prefetch=0,
                    grid=(BG,),
                    in_specs=[pl.BlockSpec((1, chunks, M),
                                           lambda i: (i, 0, 0)),
                              pl.BlockSpec((1, 3, chunks, 1),
                                           lambda i: (i, 0, 0, 0))],
                    out_specs=pl.BlockSpec((1, chunks, M),
                                           lambda i: (i, 0, 0)),
                ),
                compiler_params=pltpu.CompilerParams(
                    dimension_semantics=("parallel",)),
            )(xg, params)
            return out.reshape(B, C, H, W)

        # ---------------- two-pass fallback: pass 1 (stats -> denom) --------
        xg = x.reshape(BG, chunks, M)
        if M % 128 == 0:
            tm = _largest_aligned_divisor(
                M, max(128, (_STATS_TILE_BYTES // (chunks * itemsize))
                       // 128 * 128))
            n_mb = M // tm
            col_w = _largest_aligned_divisor(
                tm, max(128, (_VALUE_TILE_ELEMS // chunks) // 128 * 128))
            n_col = tm // col_w
            denom = pl.pallas_call(
                functools.partial(_stats_kernel, scale_fix=sfix, eps=eps,
                                  col_w=col_w, n_col=n_col),
                out_shape=jax.ShapeDtypeStruct((BG, 1), jnp.float32),
                grid_spec=pltpu.PrefetchScalarGridSpec(
                    num_scalar_prefetch=0,
                    grid=(BG, n_mb),
                    in_specs=[pl.BlockSpec((1, chunks, tm),
                                           lambda i, j: (i, 0, j))],
                    out_specs=pl.BlockSpec((1, 1), lambda i, j: (i, 0)),
                    scratch_shapes=[pltpu.VMEM((chunks, 1), jnp.float32),
                                    pltpu.VMEM((chunks, 1), jnp.float32)],
                ),
                compiler_params=pltpu.CompilerParams(
                    dimension_semantics=("parallel", "arbitrary")),
            )(xg)
        else:
            # Non-lane-aligned M that is too big to fuse: let XLA do the
            # reduction (still a single full-bandwidth HBM read of x).
            mean_max = jnp.mean(jnp.max(xg, axis=-1), axis=-1)
            mean_min = jnp.mean(jnp.min(xg, axis=-1), axis=-1)
            denom = ((mean_max - mean_min) * sfix + eps).reshape(BG, 1)
            denom = denom.astype(jnp.float32)

        denom_row = jnp.repeat(denom.reshape(B, groups), Cg,
                               axis=1).reshape(R, 1)
    else:
        denom_row = None

    # ---------------- pass 2: elementwise apply ------------------------------
    def _rowify(p):
        p = p.reshape(1, C).astype(jnp.float32)
        return jnp.broadcast_to(p, (B, C)).reshape(R, 1)

    w_row = _rowify(weight)
    b_row = _rowify(bias)
    if apply_act:
        v_row = _rowify(v)
        w_eff_row = w_row * denom_row          # fold 1/scale into the weight
    else:
        v_row = jnp.zeros((R, 1), jnp.float32)
        w_eff_row = w_row
    params_row = jnp.concatenate(
        [v_row, w_eff_row, b_row, jnp.zeros((R, 1), jnp.float32)], axis=1)

    x2 = x.reshape(R, HW)
    # Inner value tile (rs, cw) of ~64 KiB and block rows tr = nr * rs.
    if HW % 128 == 0:
        cw = _largest_aligned_divisor(HW, min(HW, 2048))
    else:
        cw = HW
    rs = max(8, min(1024, (_VALUE_TILE_ELEMS // cw) // 8 * 8))
    rows_target = max(rs, _APPLY_TILE_BYTES // max(1, HW * itemsize))
    nr = max(1, rows_target // rs)
    nr = min(nr, max(1, 64 // max(1, HW // cw)))   # cap in-kernel unroll count
    tr = nr * rs
    if tr >= R:
        tr = R
    n_rb = pl.cdiv(R, tr)

    out2 = pl.pallas_call(
        functools.partial(_apply_kernel, rs=rs, cw=cw, apply_act=apply_act),
        out_shape=jax.ShapeDtypeStruct((R, HW), dtype),
        grid_spec=pltpu.PrefetchScalarGridSpec(
            num_scalar_prefetch=0,
            grid=(n_rb,),
            in_specs=[pl.BlockSpec((tr, HW), lambda i: (i, 0)),
                      pl.BlockSpec((tr, 4), lambda i: (i, 0))],
            out_specs=pl.BlockSpec((tr, HW), lambda i: (i, 0)),
        ),
        compiler_params=pltpu.CompilerParams(
            dimension_semantics=("parallel",)),
    )(x2, params_row)
    return out2.reshape(B, C, H, W)


# ----------------------------------------------------------------------------
# Pure-JAX reference (mirrors the PyTorch forward)
# ----------------------------------------------------------------------------
def _reference(x, weight, bias, v, *, chunks, groups, eps, apply_act=True):
    B, C, H, W = x.shape
    y = x.reshape(B, groups, chunks, -1)
    M = y.shape[-1]
    mean_max = jnp.mean(jnp.max(y, axis=-1), axis=-1)     # (B, G)
    mean_min = jnp.mean(jnp.min(y, axis=-1), axis=-1)
    scale = 1.0 / ((mean_max - mean_min) * _scale_fix(M) + eps)
    if apply_act:
        n = x * jax.nn.sigmoid(x * v)
        xr = n.reshape(B, groups, -1) / scale[:, :, None]
        x = xr.reshape(B, C, H, W)
    return x * weight + bias


if __name__ == "__main__":
    key = jax.random.PRNGKey(0)
    kx, kw, kb, kv = jax.random.split(key, 4)

    def make(B, C, H, W):
        x = jax.random.normal(kx, (B, C, H, W), dtype=jnp.float32)
        ps = (1, C, 1, 1)
        w = jax.random.uniform(kw, ps, jnp.float32, 0.5, 1.5)
        b = 0.1 * jax.random.normal(kb, ps, jnp.float32)
        vv = jax.random.uniform(kv, ps, jnp.float32, 0.5, 1.5)
        return x, w, b, vv

    def check(B, C, H, W, apply_act=True):
        x, w, b, vv = make(B, C, H, W)
        out = range_en_full(x, w, b, vv, chunks=16, groups=8, eps=1e-5,
                            apply_act=apply_act)
        out = jax.block_until_ready(out)
        ref = _reference(x, w, b, vv, chunks=16, groups=8, eps=1e-5,
                         apply_act=apply_act)
        assert out.shape == ref.shape
        err = float(jnp.max(jnp.abs(out - ref)))
        assert jnp.allclose(out, ref, atol=1e-4, rtol=1e-4), \
            ((B, C, H, W, apply_act), err)

    check(2, 16, 16, 16, apply_act=True)    # fused single-pass path
    check(2, 16, 16, 16, apply_act=False)   # affine-only (no-act) path
    check(2, 48, 32, 32, apply_act=True)    # two-pass path (Pallas stats)
    check(2, 24, 8, 8, apply_act=True)      # two-pass path (jnp-stats guard)
    print("KERNEL_OK")
</pallas_src>

<mosaic_0001>
module attributes {stable_mosaic.version = 11 : i64} {
  func.func @_fused_kernel(%arg0: i32, %arg1: memref<1x16x32xf32, #tpu.memory_space<vmem>>, %arg2: memref<1x3x16x1xf32, #tpu.memory_space<vmem>>, %arg3: memref<1x16x32xf32, #tpu.memory_space<vmem>>) attributes {dimension_semantics = [#tpu.dimension_semantics<parallel>], iteration_bounds = array<i64: 16>, scalar_prefetch = 0 : i64, scratch_operands = 0 : i64, tpu.core_type = #tpu.core_type<tc>, window_params = [{transform_indices = @transform_0, window_bounds = array<i64: 1, 16, 32>}, {transform_indices = @transform_1, window_bounds = array<i64: 1, 3, 16, 1>}, {transform_indices = @transform_2, window_bounds = array<i64: 1, 16, 32>}]} {
    %c0 = arith.constant 0 : index
    %c0_0 = arith.constant 0 : index
    %c0_1 = arith.constant 0 : index
    %c0_2 = arith.constant 0 : index
    %0 = vector.load %arg2[%c0, %c0_0, %c0_1, %c0_2] : memref<1x3x16x1xf32, #tpu.memory_space<vmem>>, vector<1x1x16x1xf32>
    %1 = vector.shape_cast %0 : vector<1x1x16x1xf32> to vector<16x1xf32>
    %c0_3 = arith.constant 0 : index
    %c1 = arith.constant 1 : index
    %c0_4 = arith.constant 0 : index
    %c0_5 = arith.constant 0 : index
    %2 = vector.load %arg2[%c0_3, %c1, %c0_4, %c0_5] : memref<1x3x16x1xf32, #tpu.memory_space<vmem>>, vector<1x1x16x1xf32>
    %3 = vector.shape_cast %2 : vector<1x1x16x1xf32> to vector<16x1xf32>
    %c0_6 = arith.constant 0 : index
    %c2 = arith.constant 2 : index
    %c0_7 = arith.constant 0 : index
    %c0_8 = arith.constant 0 : index
    %4 = vector.load %arg2[%c0_6, %c2, %c0_7, %c0_8] : memref<1x3x16x1xf32, #tpu.memory_space<vmem>>, vector<1x1x16x1xf32>
    %5 = vector.shape_cast %4 : vector<1x1x16x1xf32> to vector<16x1xf32>
    %c0_9 = arith.constant 0 : index
    %c0_10 = arith.constant 0 : index
    %c0_11 = arith.constant 0 : index
    %6 = vector.load %arg1[%c0_9, %c0_10, %c0_11] : memref<1x16x32xf32, #tpu.memory_space<vmem>>, vector<1x16x32xf32>
    %7 = vector.shape_cast %6 : vector<1x16x32xf32> to vector<16x32xf32>
    %cst = arith.constant dense<0xFF800000> : vector<16xf32>
    %8 = vector.multi_reduction <maximumf>, %7, %cst [1] : vector<16x32xf32> to vector<16xf32>
    %9 = vector.shape_cast %8 : vector<16xf32> to vector<16x1xf32>
    %cst_12 = arith.constant dense<0x7F800000> : vector<16xf32>
    %10 = vector.multi_reduction <minimumf>, %7, %cst_12 [1] : vector<16x32xf32> to vector<16xf32>
    %11 = vector.shape_cast %10 : vector<16xf32> to vector<16x1xf32>
    %cst_13 = arith.constant dense<0.000000e+00> : vector<1xf32>
    %12 = vector.multi_reduction <add>, %9, %cst_13 [0] : vector<16x1xf32> to vector<1xf32>
    %13 = vector.shape_cast %12 : vector<1xf32> to vector<1x1xf32>
    %cst_14 = arith.constant 1.600000e+01 : f32
    %14 = vector.broadcast %cst_14 : f32 to vector<1x1xf32>
    %15 = arith.divf %13, %14 : vector<1x1xf32>
    %cst_15 = arith.constant dense<0.000000e+00> : vector<1xf32>
    %16 = vector.multi_reduction <add>, %11, %cst_15 [0] : vector<16x1xf32> to vector<1xf32>
    %17 = vector.shape_cast %16 : vector<1xf32> to vector<1x1xf32>
    %cst_16 = arith.constant 1.600000e+01 : f32
    %18 = vector.broadcast %cst_16 : f32 to vector<1x1xf32>
    %19 = arith.divf %17, %18 : vector<1x1xf32>
    %20 = arith.subf %15, %19 : vector<1x1xf32>
    %cst_17 = arith.constant 0.205186397 : f32
    %21 = vector.broadcast %cst_17 : f32 to vector<1x1xf32>
    %22 = arith.mulf %20, %21 : vector<1x1xf32>
    %cst_18 = arith.constant 9.99999974E-6 : f32
    %23 = vector.broadcast %cst_18 : f32 to vector<1x1xf32>
    %24 = arith.addf %22, %23 : vector<1x1xf32>
    %25 = vector.broadcast %24 : vector<1x1xf32> to vector<16x1xf32>
    %26 = arith.mulf %3, %25 : vector<16x1xf32>
    %c0_19 = arith.constant 0 : index
    %c0_20 = arith.constant 0 : index
    %c0_21 = arith.constant 0 : index
    %27 = vector.load %arg1[%c0_19, %c0_20, %c0_21] : memref<1x16x32xf32, #tpu.memory_space<vmem>>, vector<1x16x32xf32>
    %28 = vector.shape_cast %27 : vector<1x16x32xf32> to vector<16x32xf32>
    %29 = vector.broadcast %1 : vector<16x1xf32> to vector<16x32xf32>
    %30 = arith.mulf %28, %29 : vector<16x32xf32>
    %cst_22 = arith.constant 5.000000e-01 : f32
    %31 = vector.broadcast %cst_22 : f32 to vector<16x32xf32>
    %32 = arith.mulf %31, %30 : vector<16x32xf32>
    %33 = math.tanh %32 : vector<16x32xf32>
    %cst_23 = arith.constant 5.000000e-01 : f32
    %34 = vector.broadcast %cst_23 : f32 to vector<16x32xf32>
    %35 = arith.mulf %34, %33 : vector<16x32xf32>
    %cst_24 = arith.constant 5.000000e-01 : f32
    %36 = vector.broadcast %cst_24 : f32 to vector<16x32xf32>
    %37 = arith.addf %35, %36 : vector<16x32xf32>
    %38 = arith.mulf %28, %37 : vector<16x32xf32>
    %39 = vector.broadcast %26 : vector<16x1xf32> to vector<16x32xf32>
    %40 = arith.mulf %38, %39 : vector<16x32xf32>
    %41 = vector.broadcast %5 : vector<16x1xf32> to vector<16x32xf32>
    %42 = arith.addf %40, %41 : vector<16x32xf32>
    %c0_25 = arith.constant 0 : index
    %c0_26 = arith.constant 0 : index
    %c0_27 = arith.constant 0 : index
    %43 = vector.load %arg3[%c0_25, %c0_26, %c0_27] : memref<1x16x32xf32, #tpu.memory_space<vmem>>, vector<1x16x32xf32>
    %44 = vector.shape_cast %43 : vector<1x16x32xf32> to vector<16x32xf32>
    %45 = vector.shape_cast %42 : vector<16x32xf32> to vector<1x16x32xf32>
    tpu.vector_store %arg3[%c0_25, %c0_26, %c0_27], %45 {strides = array<i32>} : memref<1x16x32xf32, #tpu.memory_space<vmem>>, vector<1x16x32xf32>,
    return
  }
  func.func @transform_0(%arg0: i32) -> (i32, i32, i32) {
    %c0_i32 = arith.constant 0 : i32
    %c0_i32_0 = arith.constant 0 : i32
    %c0_i32_1 = arith.constant 0 : i32
    return %arg0, %c0_i32, %c0_i32_0 : i32, i32, i32
  }
  func.func @transform_1(%arg0: i32) -> (i32, i32, i32, i32) {
    %c0_i32 = arith.constant 0 : i32
    %c0_i32_0 = arith.constant 0 : i32
    %c0_i32_1 = arith.constant 0 : i32
    %c0_i32_2 = arith.constant 0 : i32
    return %arg0, %c0_i32, %c0_i32_0, %c0_i32_1 : i32, i32, i32, i32
  }
  func.func @transform_2(%arg0: i32) -> (i32, i32, i32) {
    %c0_i32 = arith.constant 0 : i32
    %c0_i32_0 = arith.constant 0 : i32
    %c0_i32_1 = arith.constant 0 : i32
    return %arg0, %c0_i32, %c0_i32_0 : i32, i32, i32
  }
}

</mosaic_0001>

<bundles_post_ra>
// kernel: tpu_custom_call.1
= control target key start
LH: loop header
LB: loop body
LE: loop exit
PB: predicated region body
PF: predicated region fallthrough
CT: control target
= control target key end

     0   :  { %7 = vsyncpa [#allocation3], 0  ;;  %s626_s0 = inlined_call_operand.vmem [shape: f32[16,16,32], index: 0, kind: input, shape index: {}]   ;;  %s627_s1 = inlined_call_operand.vmem [shape: f32[16,3,16,1], index: 1, kind: input, shape index: {}]   ;;  %s628_s2 = inlined_call_operand.hbm [shape: f32[16,16,32], index: 2, kind: output, shape index: {}]  }
   0x1   :  { %9 = vsyncpa [#allocation3 + $0x1], 0  ;;  %s494_s9 = smov 0   ;;  %s496_s10 = smov 0  }
   0x2   :  { %s498_s11 = smov 0   ;;  %s500_s12 = smov 0  }
   0x3 LB: > { %s515_s13 = sadd.s32 4294967295, %s473_s12   ;;  %s343_s14 = sadd.s32 4294967294, %s473_s12   ;;  %s473_s12 = sphi %s500_s12, %s634_s12   ;;  %s469_s11 = sphi %s498_s11, %s633_s11   ;;  %s465_s10 = sphi %s496_s10, %s632_s10   ;;  %s461_s9 = sphi %s494_s9, %s631_s9  }
   0x4   : > { %s519_s15 = sadd.s32 1, %s473_s12   ;;  %s74_s16 = sadd.s32 1, %s469_s11 }
   0x5   : > { %s71_s17 = ssub.s32 %s473_s12, %s519_s15  ;;  %p84_p0 = scmp.ne.s32.totalorder %s469_s11, %s465_s10 }
   0x6   : > { %p72_p1 = scmp.eq.s32.totalorder %s71_s17, 0  ;;  %p85_p2 = scmp.eq.s32.totalorder %s515_s13, 15 }
   0x7   : > { %p90_p3 = scmp.ne.s32.totalorder %s465_s10, %s461_s9  ;;  %p91_p4 = scmp.eq.s32.totalorder %s343_s14, 15 }
   0x8   : > { %s530_s18 = scalar_select %p72_p1, %s469_s11, %s74_s16  }
   0x9   : > { %p532_p5 = por %p85_p2, %p84_p0  ;;  %p536_p6 = por %p91_p4, %p90_p3 }
   0xa   : > { %p346_p7 = scmp.ge.s32.totalorder %s473_s12, 1  ;;  %p125_p8 = scmp.lt.s32.totalorder %s473_s12, 17 }
   0xc   : > { %p126_p9 = pnand %p346_p7, %p125_p8 }
   0xd   : > { %p152_p10 = scmp.lt.s32.totalorder (!%p126_p9), %s515_s13, 15  ;;  %vm172_vm0 = vcmask (!%p126_p9), 261120   ;;  %v475_v6 = vmov (!%p126_p9), 0   ;;  %s149_s30 = sand.u32 (!%p126_p9), 1, %s465_s10  }
   0xe   : > { %129 = sbr.rel (%p126_p9) target bundleno = 350 (0x15e), region = 28  ;;  %405 = vset.pattern.permute.xlu0 (!%p126_p9), %v475_v6  ;;  %406 = vset.pattern.permute.xlu1 (!%p126_p9), %v475_v6  ;;  %s347_s3 = sshll.u32 (!%p126_p9), %s149_s30, 4 }
   0xf   : > { %s151_s4 = scalar_lea.vmem (!%p126_p9), [#allocation2], %s347_s3  ;;  %s361_s6 = sshll.u32 (!%p126_p9), %s515_s13, 8 }
  0x10   : > { %s269_s5 = sshll.u32 (!%p126_p9), %s151_s4, 4  ;;  %s580_s14 = scalar_lea.hbm (!%p126_p9), %s628_s2, %s361_s6  ;;  %s582_s5 = int_to_ptr.vmem [resolvable:$true] %s269_s5 }
  0x11   : > { %s585_s16 = scalar_lea.sflag (!%p126_p9), [#allocation3], %s149_s30  ;;  %s411_s17 = scalar_lea.vmem (!%p126_p9), %s582_s5, 256 }
  0x12   : > { %p412_p11 = scmp.ne.s32.totalorder (!%p126_p9), %s582_s5, %s411_s17 }
  0x14   : > { %p413_p12 = pnand (!%p126_p9), %p412_p11, %p532_p5 }
  0x15   : > { %s153_s21 = scalar_select %p152_p10, %s515_s13, 15 }
  0x16   : > { %p414_p13 = pneg %p413_p12  ;;  %s476_s13 = smov [#allocation2]  }
  0x17   : > { %s360_s22 = sshll.u32 %s153_s21, 4  ;;  %s362_s26 = smul.u32 48, %s153_s21 }
  0x18   : > { %s156_s25 = scalar_lea.vmem %s626_s0, %s360_s22  ;;  %s415_s21 = sshll.u32 %s476_s13, 4  ;;  %s416_s21 = int_to_ptr.vmem [resolvable:$false] %s415_s21 }
  0x19   : > { %v547_v0 = vld [vmem:[%s156_s25] sm:$0xff]  ;;  %v549_v1 = vld [vmem:[%s156_s25 + $0x8] sm:$0xff]  ;;  %s562_s29 = scalar_lea.vmem %s627_s1, %s362_s26  ;;  %s417_s22 = scalar_lea.vmem %s416_s21, 512 }
  0x1a   : > { %v179_v2 = vsel %vm172_vm0, %v547_v0, inf  ;;  %v173_v3 = vsel %vm172_vm0, %v547_v0, -inf  ;;  %v182_v4 = vsel %vm172_vm0, %v549_v1, inf  ;;  %v176_v5 = vsel %vm172_vm0, %v549_v1, -inf  ;;  %v163_v7 = vld [vmem:[%s562_s29 + $0x8] sm:$0xff]  ;;  %v162_v8 = vld [vmem:[%s562_s29] sm:$0xff]  ;;  %p418_p0 = scmp.lt.s32.totalorder %s582_s5, %s416_s21  ;;  %p419_p1 = scmp.lt.s32.totalorder %s417_s22, %s411_s17 }
  0x1b   : > { %180 = vmin.xlane.f32.xlu1 %v179_v2  ;;  %174 = vmax.xlane.f32.xlu0 %v173_v3  ;;  %v353_v9 = vld [vmem:[%s562_s29 + $0x20] sm:$0xff]  ;;  %v351_v32 = vld [vmem:[%s562_s29 + $0x10] sm:$0xff]  ;;  %v352_v35 = vld [vmem:[%s562_s29 + $0x18] sm:$0xff] }
  0x1c   : > { %v354_v37 = vld [vmem:[%s562_s29 + $0x28] sm:$0xff]  ;;  %p420_p2 = por %p419_p1, %p418_p0 }
  0x1e   : > { %p421_p3 = pnand %p420_p2, %p414_p13 }
  0x1f   : > { %183 = vmin.xlane.f32.xlu1 %v182_v4  ;;  %177 = vmax.xlane.f32.xlu0 %v176_v5 }
  0x30   : > { %214 = vperm.xlu1 %406, %v163_v7  }
  0x34   : > { %243 = vperm.xlu1 %406, %v353_v9  }
  0x35   : > { %209 = vperm.xlu0 %405, %v162_v8  }
  0xa8   : > { %v181_v10 = vpop.xlane.xlu1 %180  ;;  %v175_v11 = vpop.xlane.xlu0 %174 }
  0xac   : > { %v184_v12 = vpop.xlane.xlu1 %183  ;;  %v178_v13 = vpop.xlane.xlu0 %177 }
  0xad   : > { %v194_v14 = vadd.f32 %v184_v12, %v181_v10  ;;  %v185_v15 = vadd.f32 %v178_v13, %v175_v11 }
  0xaf   : > { %v195_v16 = vrot.slane %v194_v14, 4  ;;  %v186_v17 = vrot.slane %v185_v15, 4 }
  0xb0   : > { %v215_v41 = vpop.permute.xlu1 %214 }
  0xb1   : > { %v196_v18 = vadd.f32 %v195_v16, %v194_v14  ;;  %v187_v19 = vadd.f32 %v186_v17, %v185_v15  ;;  %v218_v42 = vmul.f32 %v215_v41, %v549_v1 }
  0xb3   : > { %v197_v20 = vrot.slane %v196_v18, 2  ;;  %v188_v21 = vrot.slane %v187_v19, 2  ;;  %v220_v43 = vmul.f32 0.5, %v218_v42 }
  0xb4   : > { %v210_v38 = vpop.permute.xlu0 %209  ;;  %v244_v49 = vpop.permute.xlu1 %243 }
  0xb5   : > { %v198_v22 = vadd.f32 %v197_v20, %v196_v18  ;;  %v189_v23 = vadd.f32 %v188_v21, %v187_v19  ;;  %v217_v39 = vmul.f32 %v210_v38, %v547_v0 }
  0xb7   : > { %v199_v24 = vrot.slane %v198_v22, 1  ;;  %v190_v25 = vrot.slane %v189_v23, 1  ;;  %v219_v40 = vmul.f32 0.5, %v217_v39 }
  0xb9   : > { %v200_v26 = vadd.f32 %v199_v24, %v198_v22  ;;  %v191_v27 = vadd.f32 %v190_v25, %v189_v23  ;;  %407 = vtanh.f32 %v219_v40 }
  0xba   : > { %409 = vtanh.f32 %v220_v43 }
  0xbb   : > { %v201_v28 = vmul.f32 0.0625, %v200_v26  ;;  %v193_v29 = vmul.f32 0.0625, %v191_v27 }
  0xbd   : > { %v202_v30 = vsub.f32 %v193_v29, %v201_v28 }
  0xbf   : > { %v203_v31 = vmul.f32 0.2051864, %v202_v30 }
  0xc1   : > { %v204_v33 = vadd.f32 1e-05, %v203_v31 }
  0xc3   : > { %v205_v34 = vmul.f32 %v351_v32, %v204_v33  ;;  %v206_v36 = vmul.f32 %v352_v35, %v204_v33  ;;  %v408_v44 = vpop.eup %407 }
  0xc4   : > { %v223_v45 = vmul.f32 0.5, %v408_v44  ;;  %v410_v46 = vpop.eup %409 }
  0xc5   : > { %231 = vperm.xlu1 %406, %v205_v34   ;;  %v224_v48 = vmul.f32 0.5, %v410_v46 }
  0xc6   : > { %v225_v47 = vadd.f32 0.5, %v223_v45 }
  0xc7   : > { %v226_v51 = vadd.f32 0.5, %v224_v48 }
  0xc8   : > { %v227_v50 = vmul.f32 %v225_v47, %v547_v0 }
  0xc9   : > { %236 = vperm.xlu1 %406, %v206_v36   ;;  %v228_v55 = vmul.f32 %v226_v51, %v549_v1 }
  0xcd   : > { %248 = vperm.xlu1 %406, %v354_v37  }
 0x144   : > { %v232_v52 = vpop.permute.xlu1 %231 }
 0x145   : > { %v239_v53 = vmul.f32 %v232_v52, %v227_v50 }
 0x147   : > { %v251_v54 = vadd.f32 %v244_v49, %v239_v53 }
 0x148   : > { %v237_v56 = vpop.permute.xlu1 %236 }
 0x149   : > { %253 = vst.msk [vmem:[%s151_s4] sm:$0xff] %vm172_vm0, %v251_v54  ;;  %v240_v57 = vmul.f32 %v237_v56, %v228_v55 }
 0x14c   : > { %v249_v58 = vpop.permute.xlu1 %248 }
 0x14d   : > { %v252_v59 = vadd.f32 %v249_v58, %v240_v57 }
 0x14f   : > { %254 = vst.msk [vmem:[%s151_s4 + $0x8] sm:$0xff] %vm172_vm0, %v252_v59 }
 0x150   : > { %424 = shalt.err (!%p421_p3)
}
 0x151   : > { %s425_s23 = scalar_lea.hbm %s580_s14, 256  ;;  %s429_s26 = scalar_lea.hbm %s628_s2, 4096 }
 0x152   : > { %p426_p4 = scmp.ne.s32.totalorder %s580_s14, %s425_s23  ;;  %p430_p9 = scmp.lt.u32.totalorder %s580_s14, %s628_s2 }
 0x153   : > { %p431_p10 = scmp.lt.u32.totalorder %s429_s26, %s425_s23  ;;  %p433_p12 = scmp.lt.u32.totalorder %s425_s23, %s580_s14 }
 0x154   : > { %p427_p7 = pnand %p426_p4, %p532_p5 }
 0x155   : > { %p432_p11 = por %p431_p10, %p430_p9 }
 0x156   : > { %p428_p8 = pneg %p427_p7 }
 0x157   : > { %p434_p13 = por %p433_p12, %p432_p11 }
 0x159   : > { %p435_p0 = pnand %p434_p13, %p428_p8 }
 0x15b   : > { %438 = shalt.err (!%p435_p0)
}
 0x15c   : > { %s477_s29 = smov 128   ;;  %s478_s30 = smov 8  }
 0x15d   : > { %363 = dma.vmem_to_hbm [thread:$0]  (%p532_p5), %s582_s5, 256, %s580_s14, %s585_s16, %s477_s29, %s477_s29, %s478_s30  }
 0x15e PF: > { %p369_p1 = scmp.ge.s32.totalorder %s473_s12, 2  ;;  %s284_s3 = sand.u32 1, %s461_s9  }
 0x15f   : > { %s285_s4 = scalar_lea.sflag [#allocation3], %s284_s3 }
 0x160   : > { %p366_p2 = pnand %p369_p1, %p536_p6 }
 0x162   : > { %456 = dma.done.wait (!%p366_p2), %s285_s4, 256  }
 0x163   : > { %458 = vsyncadd (!%p366_p2), %s285_s4, 4294967040  ;;  %p12_p3 = scmp.ge.s32.totalorder %s519_s15, 18   ;;  %s631_s9 = smov %s465_s10 }
 0x164   : > { %s632_s10 = smov %s469_s11  ;;  %s633_s11 = smov %s530_s18 }
 0x165   : > { %s634_s12 = smov %s519_s15  ;;  %14 = sbr.rel (!%p12_p3) target bundleno = 3 (0x3), region = 68 }
 0x16c   :  { %290 = vsyncpa [#allocation3], 1 }
 0x16d   :  { %292 = vsyncpa [#allocation3 + $0x1], 1 }

</bundles_post_ra>
